<compile_context>
chip_gen: v7x
topology: tpu7x:2x2x1
jax: 0.10.0
libtpu: 0.0.40
codegen_flags: <defaults>
</compile_context>

<pallas_src>
import jax
import jax.numpy as jnp
from jax.experimental import pallas as pl
from jax.experimental.pallas import tpu as pltpu

HEAD_LANES = 8  # fused head width: col 0,1 = actor mean (pre-activation), col 2 = value


def actor_critic_kernel(x_ref, w_sh_ref, b_sh_ref, w_hd_ref, b_hd_ref,
                        alpha_ref, gamma_ref, mean_ref, value_ref):
    # Shared layer: [tb,16] @ [16,64] + [1,64] -> relu
    h = jnp.dot(x_ref[...], w_sh_ref[...], preferred_element_type=jnp.float32)
    h = jnp.maximum(h + b_sh_ref[...], 0.0)

    # Fused heads: [tb,64] @ [64,8] + [1,8]
    #   col 0 = 0.5 * actor_mean pre-act (throttle), col 1 = actor_mean pre-act
    #   (steer), col 2 = critic value, cols 3..7 = zero padding.
    z = jnp.dot(h, w_hd_ref[...], preferred_element_type=jnp.float32) + b_hd_ref[...]

    # Single transcendental over the 8-lane slab, then a per-lane affine:
    #   col 0: sigmoid(orig) = 0.5*tanh(orig/2) + 0.5 = 0.5*tanh(z) + 0.5
    #   col 1: tanh(z)
    # alpha = [0.5, 1, 0, ...], gamma = [0.5, 0, 0, ...] are precomputed constants.
    m = alpha_ref[...] * jnp.tanh(z) + gamma_ref[...]

    mean_ref[...] = m[:, 0:2]     # [tb, 2]
    value_ref[...] = z[:, 2:3]    # [tb, 1]  (identity)


def _round_up(n, m):
    return ((n + m - 1) // m) * m


def prepare_params(params):
    """Build the fused head weights / lane constants ONCE per parameter update."""
    w_sh, b_sh, w_cr, b_cr, w_mu, b_mu, log_std = params

    w_hd = jnp.zeros((64, HEAD_LANES), jnp.float32)
    w_hd = w_hd.at[:, 0].set(0.5 * w_mu[:, 0])   # pre-scale so sigmoid == 0.5*tanh + 0.5
    w_hd = w_hd.at[:, 1].set(w_mu[:, 1])
    w_hd = w_hd.at[:, 2].set(w_cr[:, 0])
    b_hd = jnp.zeros((1, HEAD_LANES), jnp.float32)
    b_hd = b_hd.at[0, 0].set(0.5 * b_mu[0, 0])
    b_hd = b_hd.at[0, 1].set(b_mu[0, 1])
    b_hd = b_hd.at[0, 2].set(b_cr[0, 0])

    alpha = jnp.zeros((1, HEAD_LANES), jnp.float32).at[0, 0].set(0.5).at[0, 1].set(1.0)
    gamma = jnp.zeros((1, HEAD_LANES), jnp.float32).at[0, 0].set(0.5)

    action_std = jnp.exp(log_std.reshape(2))     # batch-independent: done here, not per call
    return (w_sh, b_sh, w_hd, b_hd, alpha, gamma, action_std)


def actor_critic_forward(x, prepped, tile_b=2048):
    """x: [B,16] float32. Returns (action_mean [B,2], action_std [2], value [B,1])."""
    w_sh, b_sh, w_hd, b_hd, alpha, gamma, action_std = prepped
    B = x.shape[0]

    # Batch tile: large (amortize per-grid-step overhead), multiple of 8 sublanes,
    # capped so the "parallel" grid has >= ~4 steps when the batch is big enough
    # (keeps both v7x TensorCores fed; a no-op on v5e/v6e single-TC chips).
    tb = min(tile_b, _round_up(B, 8))
    tb = min(tb, max(8, _round_up(pl.cdiv(B, 4), 8)))
    grid = (pl.cdiv(B, tb),)   # no jnp.pad: Pallas masks the partial final block

    flops = B * (2 * 16 * 64 + 64 + 2 * 64 * HEAD_LANES + 2 * HEAD_LANES)
    bytes_accessed = 4 * (B * 16 + B * 2 + B * 1
                          + 16 * 64 + 64 + 64 * HEAD_LANES + 3 * HEAD_LANES)
    cost = pl.CostEstimate(flops=flops, transcendentals=B * HEAD_LANES,
                           bytes_accessed=bytes_accessed)

    mean, value = pl.pallas_call(
        actor_critic_kernel,
        out_shape=(jax.ShapeDtypeStruct((B, 2), jnp.float32),
                   jax.ShapeDtypeStruct((B, 1), jnp.float32)),
        grid=grid,
        in_specs=[
            pl.BlockSpec((tb, 16), lambda i: (i, 0)),            # x (streamed)
            pl.BlockSpec((16, 64), lambda i: (0, 0)),            # shared W (resident)
            pl.BlockSpec((1, 64), lambda i: (0, 0)),             # shared b
            pl.BlockSpec((64, HEAD_LANES), lambda i: (0, 0)),    # fused head W
            pl.BlockSpec((1, HEAD_LANES), lambda i: (0, 0)),     # fused head b
            pl.BlockSpec((1, HEAD_LANES), lambda i: (0, 0)),     # alpha lane constants
            pl.BlockSpec((1, HEAD_LANES), lambda i: (0, 0)),     # gamma lane constants
        ],
        out_specs=(pl.BlockSpec((tb, 2), lambda i: (i, 0)),      # action_mean
                   pl.BlockSpec((tb, 1), lambda i: (i, 0))),     # value
        compiler_params=pltpu.CompilerParams(
            dimension_semantics=("parallel",),
            vmem_limit_bytes=32 * 1024 * 1024),
        cost_estimate=cost,
    )(x, w_sh, b_sh, w_hd, b_hd, alpha, gamma)

    return mean, action_std, value


def init_params(key):
    """Deterministic init mimicking nn.Linear's U(-1/sqrt(fan_in), 1/sqrt(fan_in))."""
    ks = jax.random.split(key, 6)

    def linear(kw, kb, fan_in, fan_out):
        bound = 1.0 / jnp.sqrt(float(fan_in))
        w = jax.random.uniform(kw, (fan_in, fan_out), jnp.float32, -bound, bound)
        b = jax.random.uniform(kb, (1, fan_out), jnp.float32, -bound, bound)
        return w, b

    w_sh, b_sh = linear(ks[0], ks[1], 16, 64)   # shared: 16 -> 64
    w_mu, b_mu = linear(ks[2], ks[3], 64, 2)    # actor_mean: 64 -> 2
    w_cr, b_cr = linear(ks[4], ks[5], 64, 1)    # critic: 64 -> 1
    log_std = jnp.zeros((1, 2), jnp.float32)    # actor_log_std parameter (zeros)
    return (w_sh, b_sh, w_cr, b_cr, w_mu, b_mu, log_std)


def reference_forward(x, params):
    """Pure-JAX reference matching the PyTorch forward (continuous branch)."""
    w_sh, b_sh, w_cr, b_cr, w_mu, b_mu, log_std = params
    h = jnp.maximum(x @ w_sh + b_sh, 0.0)
    value = h @ w_cr + b_cr
    am = h @ w_mu + b_mu
    mean = jnp.stack([jax.nn.sigmoid(am[:, 0]), jnp.tanh(am[:, 1])], axis=1)
    std = jnp.exp(log_std.reshape(2))
    return mean, std, value


# TODO(synk): discrete-action branch (use_continuous_actions=False, softmax over 6
# actions) is not implemented; only the default continuous branch is kernelized.

if __name__ == "__main__":
    key = jax.random.PRNGKey(0)
    k_param, k_x, k_x2 = jax.random.split(key, 3)

    params = init_params(k_param)
    prepped = prepare_params(params)   # fused head weights built once, reused per call

    # Small case (B=8), matching the module's tiny 16-feature input.
    B = 8
    x = jax.random.normal(k_x, (B, 16), dtype=jnp.float32)
    mean, std, value = actor_critic_forward(x, prepped)
    jax.block_until_ready((mean, std, value))

    ref_mean, ref_std, ref_value = reference_forward(x, params)
    assert mean.shape == (B, 2) and std.shape == (2,) and value.shape == (B, 1)
    assert jnp.allclose(mean, ref_mean, atol=1e-5, rtol=1e-5)
    assert jnp.allclose(std, ref_std, atol=1e-5, rtol=1e-5)
    assert jnp.allclose(value, ref_value, atol=1e-5, rtol=1e-5)

    # Larger, non-multiple-of-tile batch: exercises the multi-step grid and the
    # padded (partial) final block path with no explicit jnp.pad.
    B2 = 1000
    x2 = jax.random.normal(k_x2, (B2, 16), dtype=jnp.float32)
    mean2, std2, value2 = actor_critic_forward(x2, prepped)
    jax.block_until_ready((mean2, std2, value2))
    ref_mean2, ref_std2, ref_value2 = reference_forward(x2, params)
    assert mean2.shape == (B2, 2) and value2.shape == (B2, 1)
    assert jnp.allclose(mean2, ref_mean2, atol=1e-5, rtol=1e-5)
    assert jnp.allclose(value2, ref_value2, atol=1e-5, rtol=1e-5)

    print("KERNEL_OK")
</pallas_src>

<mosaic_0001>
module attributes {stable_mosaic.version = 11 : i64} {
  func.func @actor_critic_kernel(%arg0: i32, %arg1: memref<8x16xf32, #tpu.memory_space<vmem>>, %arg2: memref<16x64xf32, #tpu.memory_space<vmem>>, %arg3: memref<1x64xf32, #tpu.memory_space<vmem>>, %arg4: memref<64x8xf32, #tpu.memory_space<vmem>>, %arg5: memref<1x8xf32, #tpu.memory_space<vmem>>, %arg6: memref<1x8xf32, #tpu.memory_space<vmem>>, %arg7: memref<1x8xf32, #tpu.memory_space<vmem>>, %arg8: memref<8x2xf32, #tpu.memory_space<vmem>>, %arg9: memref<8x1xf32, #tpu.memory_space<vmem>>) attributes {dimension_semantics = [#tpu.dimension_semantics<parallel>], iteration_bounds = array<i64: 1>, scalar_prefetch = 0 : i64, scratch_operands = 0 : i64, tpu.core_type = #tpu.core_type<tc>, window_params = [{transform_indices = @transform_0, window_bounds = array<i64: 8, 16>}, {pipeline_mode = #tpu.pipeline_mode<synchronous>, transform_indices = @transform_1, window_bounds = array<i64: 16, 64>}, {pipeline_mode = #tpu.pipeline_mode<synchronous>, transform_indices = @transform_2, window_bounds = array<i64: 1, 64>}, {pipeline_mode = #tpu.pipeline_mode<synchronous>, transform_indices = @transform_3, window_bounds = array<i64: 64, 8>}, {pipeline_mode = #tpu.pipeline_mode<synchronous>, transform_indices = @transform_4, window_bounds = array<i64: 1, 8>}, {pipeline_mode = #tpu.pipeline_mode<synchronous>, transform_indices = @transform_5, window_bounds = array<i64: 1, 8>}, {pipeline_mode = #tpu.pipeline_mode<synchronous>, transform_indices = @transform_6, window_bounds = array<i64: 1, 8>}, {transform_indices = @transform_7, window_bounds = array<i64: 8, 2>}, {transform_indices = @transform_8, window_bounds = array<i64: 8, 1>}]} {
    %c0 = arith.constant 0 : index
    %c0_0 = arith.constant 0 : index
    %0 = vector.load %arg1[%c0, %c0_0] : memref<8x16xf32, #tpu.memory_space<vmem>>, vector<8x16xf32>
    %c0_1 = arith.constant 0 : index
    %c0_2 = arith.constant 0 : index
    %1 = vector.load %arg2[%c0_1, %c0_2] : memref<16x64xf32, #tpu.memory_space<vmem>>, vector<16x64xf32>
    %cst = arith.constant dense<0.000000e+00> : vector<8x64xf32>
    %2 = tpu.matmul %0, %1, %cst {dimension_numbers = #tpu.dot_dimension_numbers<[1], [0], [0], [1], [0, 0, 1, 1], [], []>} : vector<8x16xf32>, vector<16x64xf32>, vector<8x64xf32> -> vector<8x64xf32>
    %c0_3 = arith.constant 0 : index
    %c0_4 = arith.constant 0 : index
    %3 = vector.load %arg3[%c0_3, %c0_4] : memref<1x64xf32, #tpu.memory_space<vmem>>, vector<1x64xf32>
    %4 = vector.broadcast %3 : vector<1x64xf32> to vector<8x64xf32>
    %5 = arith.addf %2, %4 : vector<8x64xf32>
    %cst_5 = arith.constant 0.000000e+00 : f32
    %6 = vector.broadcast %cst_5 : f32 to vector<8x64xf32>
    %7 = arith.maximumf %5, %6 : vector<8x64xf32>
    %c0_6 = arith.constant 0 : index
    %c0_7 = arith.constant 0 : index
    %8 = vector.load %arg4[%c0_6, %c0_7] : memref<64x8xf32, #tpu.memory_space<vmem>>, vector<64x8xf32>
    %cst_8 = arith.constant dense<0.000000e+00> : vector<8x8xf32>
    %9 = tpu.matmul %7, %8, %cst_8 {dimension_numbers = #tpu.dot_dimension_numbers<[1], [0], [0], [1], [0, 0, 1, 1], [], []>} : vector<8x64xf32>, vector<64x8xf32>, vector<8x8xf32> -> vector<8x8xf32>
    %c0_9 = arith.constant 0 : index
    %c0_10 = arith.constant 0 : index
    %10 = vector.load %arg5[%c0_9, %c0_10] : memref<1x8xf32, #tpu.memory_space<vmem>>, vector<1x8xf32>
    %11 = vector.broadcast %10 : vector<1x8xf32> to vector<8x8xf32>
    %12 = arith.addf %9, %11 : vector<8x8xf32>
    %c0_11 = arith.constant 0 : index
    %c0_12 = arith.constant 0 : index
    %13 = vector.load %arg6[%c0_11, %c0_12] : memref<1x8xf32, #tpu.memory_space<vmem>>, vector<1x8xf32>
    %14 = math.tanh %12 : vector<8x8xf32>
    %15 = vector.broadcast %13 : vector<1x8xf32> to vector<8x8xf32>
    %16 = arith.mulf %15, %14 : vector<8x8xf32>
    %c0_13 = arith.constant 0 : index
    %c0_14 = arith.constant 0 : index
    %17 = vector.load %arg7[%c0_13, %c0_14] : memref<1x8xf32, #tpu.memory_space<vmem>>, vector<1x8xf32>
    %18 = vector.broadcast %17 : vector<1x8xf32> to vector<8x8xf32>
    %19 = arith.addf %16, %18 : vector<8x8xf32>
    %20 = vector.extract_strided_slice %19 {offsets = [0, 0], sizes = [8, 2], strides = [1, 1]} : vector<8x8xf32> to vector<8x2xf32>
    %c0_15 = arith.constant 0 : index
    %c0_16 = arith.constant 0 : index
    %21 = vector.load %arg8[%c0_15, %c0_16] : memref<8x2xf32, #tpu.memory_space<vmem>>, vector<8x2xf32>
    tpu.vector_store %arg8[%c0_15, %c0_16], %20 {strides = array<i32>} : memref<8x2xf32, #tpu.memory_space<vmem>>, vector<8x2xf32>,
    %22 = vector.extract_strided_slice %12 {offsets = [0, 2], sizes = [8, 1], strides = [1, 1]} : vector<8x8xf32> to vector<8x1xf32>
    %c0_17 = arith.constant 0 : index
    %c0_18 = arith.constant 0 : index
    %23 = vector.load %arg9[%c0_17, %c0_18] : memref<8x1xf32, #tpu.memory_space<vmem>>, vector<8x1xf32>
    tpu.vector_store %arg9[%c0_17, %c0_18], %22 {strides = array<i32>} : memref<8x1xf32, #tpu.memory_space<vmem>>, vector<8x1xf32>,
    return
  }
  func.func @transform_0(%arg0: i32) -> (i32, i32) {
    %c0_i32 = arith.constant 0 : i32
    %c0_i32_0 = arith.constant 0 : i32
    return %arg0, %c0_i32 : i32, i32
  }
  func.func @transform_1(%arg0: i32) -> (i32, i32) {
    %c0_i32 = arith.constant 0 : i32
    %c0_i32_0 = arith.constant 0 : i32
    %c0_i32_1 = arith.constant 0 : i32
    return %c0_i32, %c0_i32_0 : i32, i32
  }
  func.func @transform_2(%arg0: i32) -> (i32, i32) {
    %c0_i32 = arith.constant 0 : i32
    %c0_i32_0 = arith.constant 0 : i32
    %c0_i32_1 = arith.constant 0 : i32
    return %c0_i32, %c0_i32_0 : i32, i32
  }
  func.func @transform_3(%arg0: i32) -> (i32, i32) {
    %c0_i32 = arith.constant 0 : i32
    %c0_i32_0 = arith.constant 0 : i32
    %c0_i32_1 = arith.constant 0 : i32
    return %c0_i32, %c0_i32_0 : i32, i32
  }
  func.func @transform_4(%arg0: i32) -> (i32, i32) {
    %c0_i32 = arith.constant 0 : i32
    %c0_i32_0 = arith.constant 0 : i32
    %c0_i32_1 = arith.constant 0 : i32
    return %c0_i32, %c0_i32_0 : i32, i32
  }
  func.func @transform_5(%arg0: i32) -> (i32, i32) {
    %c0_i32 = arith.constant 0 : i32
    %c0_i32_0 = arith.constant 0 : i32
    %c0_i32_1 = arith.constant 0 : i32
    return %c0_i32, %c0_i32_0 : i32, i32
  }
  func.func @transform_6(%arg0: i32) -> (i32, i32) {
    %c0_i32 = arith.constant 0 : i32
    %c0_i32_0 = arith.constant 0 : i32
    %c0_i32_1 = arith.constant 0 : i32
    return %c0_i32, %c0_i32_0 : i32, i32
  }
  func.func @transform_7(%arg0: i32) -> (i32, i32) {
    %c0_i32 = arith.constant 0 : i32
    %c0_i32_0 = arith.constant 0 : i32
    return %arg0, %c0_i32 : i32, i32
  }
  func.func @transform_8(%arg0: i32) -> (i32, i32) {
    %c0_i32 = arith.constant 0 : i32
    %c0_i32_0 = arith.constant 0 : i32
    return %arg0, %c0_i32 : i32, i32
  }
}

</mosaic_0001>

<bundles_post_ra>
// kernel: tpu_custom_call.1
= control target key start
LH: loop header
LB: loop body
LE: loop exit
PB: predicated region body
PF: predicated region fallthrough
CT: control target
= control target key end

     0   :  { %v300_v0 = vmov 0.0|0.0   ;;  %vm301_vm0 = vmmov 0   ;;  %v302_v3 = vmov 0.0   ;;  %vm38_vm1 = vcmask 130048   ;;  %s400_s1 = inlined_call_operand.vmem [shape: f32[16,64], index: 1, kind: input, shape index: {}]   ;;  %s401_s3 = inlined_call_operand.vmem [shape: f32[64,8], index: 3, kind: input, shape index: {}]   ;;  %s402_s0 = inlined_call_operand.vmem [shape: f32[8,16], index: 0, kind: input, shape index: {}]   ;;  %s403_s2 = inlined_call_operand.vmem [shape: f32[1,64], index: 2, kind: input, shape index: {}]   ;;  %s404_s4 = inlined_call_operand.vmem [shape: f32[1,8], index: 4, kind: input, shape index: {}]   ;;  %s405_s5 = inlined_call_operand.vmem [shape: f32[1,8], index: 5, kind: input, shape index: {}]   ;;  %s406_s6 = inlined_call_operand.vmem [shape: f32[1,8], index: 6, kind: input, shape index: {}]   ;;  %s407_s7 = inlined_call_operand.vmem [shape: f32[8,2], index: 7, kind: output, shape index: {0}]   ;;  %s408_s8 = inlined_call_operand.vmem [shape: f32[8,1], index: 8, kind: output, shape index: {1}]  }
   0x1   :  { %279 = vmatprep.subr.bf16.mxu0 %v300_v0  ;;  %v29_v1 = vld [vmem:[%s400_s1] sm:$0xff]  ;;  %v30_v2 = vld [vmem:[%s400_s1 + $0x8] sm:$0xff]  ;;  %257 = vmatprep.mubr.msk.f32.mxu0 %vm301_vm0, %v302_v3  ;;  %v115_v7 = vld [vmem:[%s401_s3 + $0x10] sm:$0xff]  ;;  %vm128_vm2 = vcmask 523264   ;;  %vm219_vm3 = vcmask 15360   ;;  %vm225_vm4 = vcmask 7168  }
   0x2   :  { %v280_v4 = vpack.c.bf16 %v30_v2, %v29_v1  ;;  %282 = vmatprep.subr.bf16.mxu1 %v300_v0  ;;  %v113_v5 = vld [vmem:[%s401_s3] sm:$0xff]  ;;  %v114_v6 = vld [vmem:[%s401_s3 + $0x8] sm:$0xff]  ;;  %276 = vmatprep.mubr.msk.f32.mxu1 %vm301_vm0, %v302_v3  ;;  %v116_v9 = vld [vmem:[%s401_s3 + $0x18] sm:$0xff] }
   0x3   :  { %v283_v8 = vpack.c.bf16 %v114_v6, %v113_v5  ;;  %v28_v10 = vld [vmem:[%s402_s0] sm:$0xff]  ;;  %v286_v11 = vpack.c.bf16 %v116_v9, %v115_v7  ;;  %v118_v13 = vld [vmem:[%s401_s3 + $0x28] sm:$0xff]  ;;  %v119_v15 = vld [vmem:[%s401_s3 + $0x30] sm:$0xff] }
   0x4   :  { %281 = vmatpush3.bf16.msra.mxu0 %v280_v4  ;;  %v117_v12 = vld [vmem:[%s401_s3 + $0x20] sm:$0xff]  ;;  %v120_v16 = vld [vmem:[%s401_s3 + $0x38] sm:$0xff]  ;;  %s303_s3 = smov 126  }
   0x5   :  { %284 = vmatpush3.bf16.msra.mxu1 %v283_v8  ;;  %v289_v14 = vpack.c.bf16 %v118_v13, %v117_v12  ;;  %v292_v17 = vpack.c.bf16 %v120_v16, %v119_v15  ;;  %v235_v18 = vld [vmem:[%s403_s2] ss:$0 sm:$0xff] }
   0x6   :  { %285 = vmatprep.subr.bf16.mxu1 %v300_v0  ;;  %v237_v23 = vld [vmem:[%s404_s4] ss:$0 sm:$0xff] }
   0x7   :  { %258 = vmatmul.mubr.msk.f32.vlgmr.msra.gmra.mrb[0].mxu0 %vm38_vm1, %v28_v10  ;;  %v239_v27 = vld [vmem:[%s405_s5] ss:$0 sm:$0xff] }
   0x8   :  { %v240_v29 = vld [vmem:[%s406_s6] ss:$0 sm:$0xff] }
   0x9   :  { %287 = vmatpush3.bf16.msra.mxu1 %v286_v11 }
   0xa   :  { %288 = vmatprep.subr.bf16.mxu1 %v300_v0 }
   0xd   :  { %290 = vmatpush3.bf16.msra.mxu1 %v289_v14 }
   0xe   :  { %291 = vmatprep.subr.bf16.mxu1 %v300_v0 }
  0x11   :  { %293 = vmatpush3.bf16.msra.mxu1 %v292_v17 }
  0xda   :  { %v108_v19 = vpop.f32.mrb[0].mxu0 }
  0xdb   :  { %v109_v20 = vadd.f32 %v235_v18, %v108_v19  ;;  %v259_v21 = vpop.f32.mrb[1].mxu0 }
  0xdd   :  { %v112_v22 = vmax.f32 %v109_v20, 0.0 }
  0xdf   :  { %277 = vmatmul.mubr.msk.f32.vlgmr.msra.gmra.mrb[0].mxu1 %vm128_vm2, %v112_v22 }
 0x1b2   :  { %v198_v24 = vpop.f32.mrb[0].mxu1 }
 0x1b3   :  { %v199_v25 = vadd.f32 %v237_v23, %v198_v24  ;;  %v278_v26 = vpop.f32.mrb[1].mxu1 }
 0x1b5   :  { %298 = vtanh.f32 %v199_v25  ;;  %222 = vrot.lane.b32.xlu0 %v199_v25, %s303_s3 }
 0x1bf   :  { %v299_v28 = vpop.eup %298 }
 0x1c0   :  { %v210_v30 = vmul.f32 %v299_v28, %v239_v27 }
 0x1c2   :  { %v218_v31 = vadd.f32 %v240_v29, %v210_v30 }
 0x1c4   :  { %220 = vst.msk [vmem:[%s407_s7] sm:$0xff] %vm219_vm3, %v218_v31 }
 0x227   :  { %v223_v32 = vpop.permute.xlu0 %222 }
 0x228   :  { %226 = vst.msk [vmem:[%s408_s8] sm:$0xff] %vm225_vm4, %v223_v32 }

</bundles_post_ra>
